<compile_context>
chip_gen: v5e
topology: v5e:2x2
jax: 0.10.0
libtpu: 0.0.40
codegen_flags: <defaults>
</compile_context>

<pallas_src>
import jax
import jax.numpy as jnp
from jax.experimental import pallas as pl
from jax.experimental.pallas import tpu as pltpu

EPS = 1e-5


# ----------------------------------------------------------------------------
# Kernel 1: 3x3 conv (stride 1, "same" zero padding) + BN partial statistics.
# Grid over batch (parallel).  One image per program.
# ----------------------------------------------------------------------------
def conv3x3_stats_kernel(x_ref, w_ref, y_ref, stats_ref):
    # x_ref:     (1, H, W*Cin)        lane-dense input image
    # w_ref:     (3, W*Cin, W*Cout)   banded weights, one band per kernel row dy
    # y_ref:     (1, H, W*Cout)       lane-dense conv output
    # stats_ref: (1, 2, W*Cout)       per-image [sum, sum of squares]
    H = y_ref.shape[1]
    x = x_ref[0]                                             # (H, W*Cin)
    zrow = jnp.zeros((1, x.shape[1]), jnp.float32)
    x_up = jnp.concatenate([zrow, x[:H - 1, :]], axis=0)     # row h-1 (zero at top)
    x_dn = jnp.concatenate([x[1:, :], zrow], axis=0)         # row h+1 (zero at bottom)

    acc = jnp.dot(x_up, w_ref[0], preferred_element_type=jnp.float32)
    acc = acc + jnp.dot(x, w_ref[1], preferred_element_type=jnp.float32)
    acc = acc + jnp.dot(x_dn, w_ref[2], preferred_element_type=jnp.float32)

    y_ref[0] = acc                                           # lane-dense store
    s = jnp.sum(acc, axis=0, keepdims=True)                  # (1, W*Cout)
    ss = jnp.sum(acc * acc, axis=0, keepdims=True)           # (1, W*Cout)
    stats_ref[0] = jnp.concatenate([s, ss], axis=0)          # (2, W*Cout)


def conv3x3_stats(x_flat, w_band):
    # x_flat: (N, H, W*Cin), w_band: (3, W*Cin, W*Cout)
    N, H, WCi = x_flat.shape
    WCo = w_band.shape[2]
    return pl.pallas_call(
        conv3x3_stats_kernel,
        out_shape=(jax.ShapeDtypeStruct((N, H, WCo), jnp.float32),
                   jax.ShapeDtypeStruct((N, 2, WCo), jnp.float32)),
        grid=(N,),
        in_specs=[
            pl.BlockSpec((1, H, WCi), lambda n: (n, 0, 0)),
            pl.BlockSpec((3, WCi, WCo), lambda n: (0, 0, 0)),
        ],
        out_specs=[
            pl.BlockSpec((1, H, WCo), lambda n: (n, 0, 0)),
            pl.BlockSpec((1, 2, WCo), lambda n: (n, 0, 0)),
        ],
        compiler_params=pltpu.CompilerParams(dimension_semantics=("parallel",)),
    )(x_flat, w_band)


def make_banded_weights(w_oihw, W):
    # w_oihw: (Cout, Cin, 3, 3) -> (3, W*Cin, W*Cout) banded matrices (per dy).
    # band[dy][u*Cin+ci, w*Cout+co] = w[co, ci, dy, u-w+1] when 0 <= u-w+1 <= 2
    # else 0 (out-of-range taps dropped == zero padding along W).
    Cout, Cin = w_oihw.shape[0], w_oihw.shape[1]
    base = jnp.transpose(w_oihw, (2, 3, 1, 0))               # (dy, dx, Cin, Cout)
    u = jnp.arange(W)[:, None]                               # input column
    w = jnp.arange(W)[None, :]                               # output column
    dx = u - w + 1
    valid = (dx >= 0) & (dx <= 2)
    t = base[:, jnp.clip(dx, 0, 2)]                          # (3, W, W, Cin, Cout)
    t = jnp.where(valid[None, :, :, None, None], t, 0.0)
    t = jnp.transpose(t, (0, 1, 3, 2, 4))                    # (3, W, Cin, W, Cout)
    return t.reshape(3, W * Cin, W * Cout).astype(jnp.float32)


# ----------------------------------------------------------------------------
# Kernels 2/3: normalize (+ residual) + ReLU.  Purely elementwise, lane-dense,
# gridded over N.  scale/shift are per-channel affine terms precomputed from
# the conv-epilogue statistics and tiled across W so they broadcast over the
# fused (W*C) lane axis.
# ----------------------------------------------------------------------------
def bn_relu_kernel(y_ref, sc_ref, sh_ref, o_ref):
    o_ref[0] = jnp.maximum(y_ref[0] * sc_ref[...] + sh_ref[...], 0.0)


def bn_add_relu_kernel(y_ref, sc_ref, sh_ref, res_ref, o_ref):
    o_ref[0] = jnp.maximum(y_ref[0] * sc_ref[...] + sh_ref[...] + res_ref[0], 0.0)


def _bn_scale_shift(stats, gamma, beta, count, W):
    # stats: (N, 2, W*C) per-image partial sums from the conv epilogue (O(C) math).
    C = gamma.shape[0]
    tot = jnp.sum(stats.reshape(stats.shape[0], 2, W, C), axis=(0, 2))   # (2, C)
    mean = tot[0] / count
    var = tot[1] / count - mean * mean        # biased variance (PyTorch training fwd)
    scale = gamma * jax.lax.rsqrt(var + EPS)
    shift = beta - mean * scale
    return (jnp.tile(scale, W).reshape(1, W * C),
            jnp.tile(shift, W).reshape(1, W * C))


def bn_relu(y, scale_row, shift_row):
    N, H, WC = y.shape
    return pl.pallas_call(
        bn_relu_kernel,
        out_shape=jax.ShapeDtypeStruct((N, H, WC), jnp.float32),
        grid=(N,),
        in_specs=[
            pl.BlockSpec((1, H, WC), lambda n: (n, 0, 0)),
            pl.BlockSpec((1, WC), lambda n: (0, 0)),
            pl.BlockSpec((1, WC), lambda n: (0, 0)),
        ],
        out_specs=pl.BlockSpec((1, H, WC), lambda n: (n, 0, 0)),
        compiler_params=pltpu.CompilerParams(dimension_semantics=("parallel",)),
    )(y, scale_row, shift_row)


def bn_add_relu(y, scale_row, shift_row, residual):
    N, H, WC = y.shape
    return pl.pallas_call(
        bn_add_relu_kernel,
        out_shape=jax.ShapeDtypeStruct((N, H, WC), jnp.float32),
        grid=(N,),
        in_specs=[
            pl.BlockSpec((1, H, WC), lambda n: (n, 0, 0)),
            pl.BlockSpec((1, WC), lambda n: (0, 0)),
            pl.BlockSpec((1, WC), lambda n: (0, 0)),
            pl.BlockSpec((1, H, WC), lambda n: (n, 0, 0)),
        ],
        out_specs=pl.BlockSpec((1, H, WC), lambda n: (n, 0, 0)),
        compiler_params=pltpu.CompilerParams(dimension_semantics=("parallel",)),
    )(y, scale_row, shift_row, residual)


# ----------------------------------------------------------------------------
# ResidualBlock forward (shortcut=None -> identity residual, needs Cin == Cout)
# ----------------------------------------------------------------------------
def residual_block(x_nchw, params):
    N, C, H, W = x_nchw.shape
    x = jnp.transpose(x_nchw, (0, 2, 3, 1)).astype(jnp.float32)   # NCHW -> NHWC
    x_flat = x.reshape(N, H, W * C)                               # lane-dense layout
    count = N * H * W

    wb1 = make_banded_weights(params["w1"], W)
    wb2 = make_banded_weights(params["w2"], W)

    # Conv biases (b1/b2) intentionally not applied: exactly cancelled by the
    # batch-statistics BatchNorm that immediately follows each conv.
    y1, st1 = conv3x3_stats(x_flat, wb1)
    sc1, sh1 = _bn_scale_shift(st1, params["g1"], params["beta1"], count, W)
    z1 = bn_relu(y1, sc1, sh1)

    y2, st2 = conv3x3_stats(z1, wb2)
    sc2, sh2 = _bn_scale_shift(st2, params["g2"], params["beta2"], count, W)
    out = bn_add_relu(y2, sc2, sh2, x_flat)

    return jnp.transpose(out.reshape(N, H, W, C), (0, 3, 1, 2))   # NHWC -> NCHW


# ----------------------------------------------------------------------------
# Pure-JAX reference (keeps the conv bias, to prove the BN cancellation).
# ----------------------------------------------------------------------------
def _ref_conv(x, w_oihw, b):
    w = jnp.transpose(w_oihw, (2, 3, 1, 0))
    y = jax.lax.conv_general_dilated(
        x, w, (1, 1), "SAME", dimension_numbers=("NHWC", "HWIO", "NHWC"))
    return y + b


def _ref_bn(y, g, b):
    mean = jnp.mean(y, axis=(0, 1, 2), keepdims=True)
    var = jnp.mean((y - mean) ** 2, axis=(0, 1, 2), keepdims=True)
    return (y - mean) * jax.lax.rsqrt(var + EPS) * g + b


def ref_residual_block(x_nchw, p):
    x = jnp.transpose(x_nchw, (0, 2, 3, 1)).astype(jnp.float32)
    y = jnp.maximum(_ref_bn(_ref_conv(x, p["w1"], p["b1"]), p["g1"], p["beta1"]), 0.0)
    y = _ref_bn(_ref_conv(y, p["w2"], p["b2"]), p["g2"], p["beta2"])
    y = jnp.maximum(y + x, 0.0)
    return jnp.transpose(y, (0, 3, 1, 2))


# ----------------------------------------------------------------------------
if __name__ == "__main__":
    N, C, H, W = 2, 8, 16, 16      # in_channels == out_channels (shortcut=None); W*C = 128
    ks = jax.random.split(jax.random.PRNGKey(0), 9)

    fan_in = C * 9
    bound = 1.0 / (fan_in ** 0.5)
    params = {
        "w1": jax.random.uniform(ks[0], (C, C, 3, 3), jnp.float32, -bound, bound),
        "b1": jax.random.uniform(ks[1], (C,), jnp.float32, -bound, bound),
        "g1": 1.0 + 0.1 * jax.random.normal(ks[2], (C,), jnp.float32),
        "beta1": 0.1 * jax.random.normal(ks[3], (C,), jnp.float32),
        "w2": jax.random.uniform(ks[4], (C, C, 3, 3), jnp.float32, -bound, bound),
        "b2": jax.random.uniform(ks[5], (C,), jnp.float32, -bound, bound),
        "g2": 1.0 + 0.1 * jax.random.normal(ks[6], (C,), jnp.float32),
        "beta2": 0.1 * jax.random.normal(ks[7], (C,), jnp.float32),
    }
    x = jax.random.normal(ks[8], (N, C, H, W), jnp.float32)

    fwd = jax.jit(residual_block)
    out = jax.block_until_ready(fwd(x, params))
    ref = jax.block_until_ready(ref_residual_block(x, params))

    assert out.shape == (N, C, H, W)
    max_err = float(jnp.max(jnp.abs(out - ref)))
    assert jnp.allclose(out, ref, rtol=1e-3, atol=1e-3), max_err
    print("KERNEL_OK")
</pallas_src>

<mosaic_0001>
module attributes {stable_mosaic.version = 11 : i64} {
  func.func @conv3x3_stats_kernel(%arg0: i32, %arg1: memref<1x16x128xf32, #tpu.memory_space<vmem>>, %arg2: memref<3x128x128xf32, #tpu.memory_space<vmem>>, %arg3: memref<1x16x128xf32, #tpu.memory_space<vmem>>, %arg4: memref<1x2x128xf32, #tpu.memory_space<vmem>>) attributes {dimension_semantics = [#tpu.dimension_semantics<parallel>], iteration_bounds = array<i64: 2>, scalar_prefetch = 0 : i64, scratch_operands = 0 : i64, tpu.core_type = #tpu.core_type<tc>, window_params = [{transform_indices = @transform_0, window_bounds = array<i64: 1, 16, 128>}, {pipeline_mode = #tpu.pipeline_mode<synchronous>, transform_indices = @transform_1, window_bounds = array<i64: 3, 128, 128>}, {transform_indices = @transform_2, window_bounds = array<i64: 1, 16, 128>}, {transform_indices = @transform_3, window_bounds = array<i64: 1, 2, 128>}]} {
    %c0 = arith.constant 0 : index
    %c0_0 = arith.constant 0 : index
    %c0_1 = arith.constant 0 : index
    %0 = vector.load %arg1[%c0, %c0_0, %c0_1] : memref<1x16x128xf32, #tpu.memory_space<vmem>>, vector<1x16x128xf32>
    %1 = vector.shape_cast %0 : vector<1x16x128xf32> to vector<16x128xf32>
    %cst = arith.constant 0.000000e+00 : f32
    %2 = vector.broadcast %cst : f32 to vector<1x128xf32>
    %3 = vector.extract_strided_slice %1 {offsets = [0, 0], sizes = [15, 128], strides = [1, 1]} : vector<16x128xf32> to vector<15x128xf32>
    %4 = tpu.concatenate %2, %3 in 0 : vector<1x128xf32>, vector<15x128xf32> -> vector<16x128xf32>
    %5 = vector.extract_strided_slice %1 {offsets = [1, 0], sizes = [15, 128], strides = [1, 1]} : vector<16x128xf32> to vector<15x128xf32>
    %6 = tpu.concatenate %5, %2 in 0 : vector<15x128xf32>, vector<1x128xf32> -> vector<16x128xf32>
    %c0_2 = arith.constant 0 : index
    %c0_3 = arith.constant 0 : index
    %c0_4 = arith.constant 0 : index
    %7 = vector.load %arg2[%c0_2, %c0_3, %c0_4] : memref<3x128x128xf32, #tpu.memory_space<vmem>>, vector<1x128x128xf32>
    %8 = vector.shape_cast %7 : vector<1x128x128xf32> to vector<128x128xf32>
    %cst_5 = arith.constant dense<0.000000e+00> : vector<16x128xf32>
    %9 = tpu.matmul %4, %8, %cst_5 {dimension_numbers = #tpu.dot_dimension_numbers<[1], [0], [0], [1], [0, 0, 1, 1], [], []>} : vector<16x128xf32>, vector<128x128xf32>, vector<16x128xf32> -> vector<16x128xf32>
    %c1 = arith.constant 1 : index
    %c0_6 = arith.constant 0 : index
    %c0_7 = arith.constant 0 : index
    %10 = vector.load %arg2[%c1, %c0_6, %c0_7] : memref<3x128x128xf32, #tpu.memory_space<vmem>>, vector<1x128x128xf32>
    %11 = vector.shape_cast %10 : vector<1x128x128xf32> to vector<128x128xf32>
    %cst_8 = arith.constant dense<0.000000e+00> : vector<16x128xf32>
    %12 = tpu.matmul %1, %11, %cst_8 {dimension_numbers = #tpu.dot_dimension_numbers<[1], [0], [0], [1], [0, 0, 1, 1], [], []>} : vector<16x128xf32>, vector<128x128xf32>, vector<16x128xf32> -> vector<16x128xf32>
    %13 = arith.addf %9, %12 : vector<16x128xf32>
    %c2 = arith.constant 2 : index
    %c0_9 = arith.constant 0 : index
    %c0_10 = arith.constant 0 : index
    %14 = vector.load %arg2[%c2, %c0_9, %c0_10] : memref<3x128x128xf32, #tpu.memory_space<vmem>>, vector<1x128x128xf32>
    %15 = vector.shape_cast %14 : vector<1x128x128xf32> to vector<128x128xf32>
    %cst_11 = arith.constant dense<0.000000e+00> : vector<16x128xf32>
    %16 = tpu.matmul %6, %15, %cst_11 {dimension_numbers = #tpu.dot_dimension_numbers<[1], [0], [0], [1], [0, 0, 1, 1], [], []>} : vector<16x128xf32>, vector<128x128xf32>, vector<16x128xf32> -> vector<16x128xf32>
    %17 = arith.addf %13, %16 : vector<16x128xf32>
    %c0_12 = arith.constant 0 : index
    %c0_13 = arith.constant 0 : index
    %c0_14 = arith.constant 0 : index
    %18 = vector.load %arg3[%c0_12, %c0_13, %c0_14] : memref<1x16x128xf32, #tpu.memory_space<vmem>>, vector<1x16x128xf32>
    %19 = vector.shape_cast %18 : vector<1x16x128xf32> to vector<16x128xf32>
    %20 = vector.shape_cast %17 : vector<16x128xf32> to vector<1x16x128xf32>
    tpu.vector_store %arg3[%c0_12, %c0_13, %c0_14], %20 {strides = array<i32>} : memref<1x16x128xf32, #tpu.memory_space<vmem>>, vector<1x16x128xf32>,
    %cst_15 = arith.constant dense<0.000000e+00> : vector<128xf32>
    %21 = vector.multi_reduction <add>, %17, %cst_15 [0] : vector<16x128xf32> to vector<128xf32>
    %22 = vector.shape_cast %21 : vector<128xf32> to vector<1x128xf32>
    %23 = arith.mulf %17, %17 : vector<16x128xf32>
    %cst_16 = arith.constant dense<0.000000e+00> : vector<128xf32>
    %24 = vector.multi_reduction <add>, %23, %cst_16 [0] : vector<16x128xf32> to vector<128xf32>
    %25 = vector.shape_cast %24 : vector<128xf32> to vector<1x128xf32>
    %26 = tpu.concatenate %22, %25 in 0 : vector<1x128xf32>, vector<1x128xf32> -> vector<2x128xf32>
    %c0_17 = arith.constant 0 : index
    %c0_18 = arith.constant 0 : index
    %c0_19 = arith.constant 0 : index
    %27 = vector.load %arg4[%c0_17, %c0_18, %c0_19] : memref<1x2x128xf32, #tpu.memory_space<vmem>>, vector<1x2x128xf32>
    %28 = vector.shape_cast %27 : vector<1x2x128xf32> to vector<2x128xf32>
    %29 = vector.shape_cast %26 : vector<2x128xf32> to vector<1x2x128xf32>
    tpu.vector_store %arg4[%c0_17, %c0_18, %c0_19], %29 {strides = array<i32>} : memref<1x2x128xf32, #tpu.memory_space<vmem>>, vector<1x2x128xf32>,
    return
  }
  func.func @transform_0(%arg0: i32) -> (i32, i32, i32) {
    %c0_i32 = arith.constant 0 : i32
    %c0_i32_0 = arith.constant 0 : i32
    %c0_i32_1 = arith.constant 0 : i32
    return %arg0, %c0_i32, %c0_i32_0 : i32, i32, i32
  }
  func.func @transform_1(%arg0: i32) -> (i32, i32, i32) {
    %c0_i32 = arith.constant 0 : i32
    %c0_i32_0 = arith.constant 0 : i32
    %c0_i32_1 = arith.constant 0 : i32
    %c0_i32_2 = arith.constant 0 : i32
    return %c0_i32, %c0_i32_0, %c0_i32_1 : i32, i32, i32
  }
  func.func @transform_2(%arg0: i32) -> (i32, i32, i32) {
    %c0_i32 = arith.constant 0 : i32
    %c0_i32_0 = arith.constant 0 : i32
    %c0_i32_1 = arith.constant 0 : i32
    return %arg0, %c0_i32, %c0_i32_0 : i32, i32, i32
  }
  func.func @transform_3(%arg0: i32) -> (i32, i32, i32) {
    %c0_i32 = arith.constant 0 : i32
    %c0_i32_0 = arith.constant 0 : i32
    %c0_i32_1 = arith.constant 0 : i32
    return %arg0, %c0_i32, %c0_i32_0 : i32, i32, i32
  }
}

module attributes {stable_mosaic.version = 11 : i64} {
  func.func @bn_relu_kernel(%arg0: i32, %arg1: memref<1x16x128xf32, #tpu.memory_space<vmem>>, %arg2: memref<1x128xf32, #tpu.memory_space<vmem>>, %arg3: memref<1x128xf32, #tpu.memory_space<vmem>>, %arg4: memref<1x16x128xf32, #tpu.memory_space<vmem>>) attributes {dimension_semantics = [#tpu.dimension_semantics<parallel>], iteration_bounds = array<i64: 2>, scalar_prefetch = 0 : i64, scratch_operands = 0 : i64, tpu.core_type = #tpu.core_type<tc>, window_params = [{transform_indices = @transform_0, window_bounds = array<i64: 1, 16, 128>}, {pipeline_mode = #tpu.pipeline_mode<synchronous>, transform_indices = @transform_1, window_bounds = array<i64: 1, 128>}, {pipeline_mode = #tpu.pipeline_mode<synchronous>, transform_indices = @transform_2, window_bounds = array<i64: 1, 128>}, {transform_indices = @transform_3, window_bounds = array<i64: 1, 16, 128>}]} {
    %c0 = arith.constant 0 : index
    %c0_0 = arith.constant 0 : index
    %c0_1 = arith.constant 0 : index
    %0 = vector.load %arg1[%c0, %c0_0, %c0_1] : memref<1x16x128xf32, #tpu.memory_space<vmem>>, vector<1x16x128xf32>
    %1 = vector.shape_cast %0 : vector<1x16x128xf32> to vector<16x128xf32>
    %c0_2 = arith.constant 0 : index
    %c0_3 = arith.constant 0 : index
    %2 = vector.load %arg2[%c0_2, %c0_3] : memref<1x128xf32, #tpu.memory_space<vmem>>, vector<1x128xf32>
    %3 = vector.broadcast %2 : vector<1x128xf32> to vector<16x128xf32>
    %4 = arith.mulf %1, %3 : vector<16x128xf32>
    %c0_4 = arith.constant 0 : index
    %c0_5 = arith.constant 0 : index
    %5 = vector.load %arg3[%c0_4, %c0_5] : memref<1x128xf32, #tpu.memory_space<vmem>>, vector<1x128xf32>
    %6 = vector.broadcast %5 : vector<1x128xf32> to vector<16x128xf32>
    %7 = arith.addf %4, %6 : vector<16x128xf32>
    %cst = arith.constant 0.000000e+00 : f32
    %8 = vector.broadcast %cst : f32 to vector<16x128xf32>
    %9 = arith.maximumf %7, %8 : vector<16x128xf32>
    %c0_6 = arith.constant 0 : index
    %c0_7 = arith.constant 0 : index
    %c0_8 = arith.constant 0 : index
    %10 = vector.load %arg4[%c0_6, %c0_7, %c0_8] : memref<1x16x128xf32, #tpu.memory_space<vmem>>, vector<1x16x128xf32>
    %11 = vector.shape_cast %10 : vector<1x16x128xf32> to vector<16x128xf32>
    %12 = vector.shape_cast %9 : vector<16x128xf32> to vector<1x16x128xf32>
    tpu.vector_store %arg4[%c0_6, %c0_7, %c0_8], %12 {strides = array<i32>} : memref<1x16x128xf32, #tpu.memory_space<vmem>>, vector<1x16x128xf32>,
    return
  }
  func.func @transform_0(%arg0: i32) -> (i32, i32, i32) {
    %c0_i32 = arith.constant 0 : i32
    %c0_i32_0 = arith.constant 0 : i32
    %c0_i32_1 = arith.constant 0 : i32
    return %arg0, %c0_i32, %c0_i32_0 : i32, i32, i32
  }
  func.func @transform_1(%arg0: i32) -> (i32, i32) {
    %c0_i32 = arith.constant 0 : i32
    %c0_i32_0 = arith.constant 0 : i32
    %c0_i32_1 = arith.constant 0 : i32
    return %c0_i32, %c0_i32_0 : i32, i32
  }
  func.func @transform_2(%arg0: i32) -> (i32, i32) {
    %c0_i32 = arith.constant 0 : i32
    %c0_i32_0 = arith.constant 0 : i32
    %c0_i32_1 = arith.constant 0 : i32
    return %c0_i32, %c0_i32_0 : i32, i32
  }
  func.func @transform_3(%arg0: i32) -> (i32, i32, i32) {
    %c0_i32 = arith.constant 0 : i32
    %c0_i32_0 = arith.constant 0 : i32
    %c0_i32_1 = arith.constant 0 : i32
    return %arg0, %c0_i32, %c0_i32_0 : i32, i32, i32
  }
}

module attributes {stable_mosaic.version = 11 : i64} {
  func.func @bn_add_relu_kernel(%arg0: i32, %arg1: memref<1x16x128xf32, #tpu.memory_space<vmem>>, %arg2: memref<1x128xf32, #tpu.memory_space<vmem>>, %arg3: memref<1x128xf32, #tpu.memory_space<vmem>>, %arg4: memref<1x16x128xf32, #tpu.memory_space<vmem>>, %arg5: memref<1x16x128xf32, #tpu.memory_space<vmem>>) attributes {dimension_semantics = [#tpu.dimension_semantics<parallel>], iteration_bounds = array<i64: 2>, scalar_prefetch = 0 : i64, scratch_operands = 0 : i64, tpu.core_type = #tpu.core_type<tc>, window_params = [{transform_indices = @transform_0, window_bounds = array<i64: 1, 16, 128>}, {pipeline_mode = #tpu.pipeline_mode<synchronous>, transform_indices = @transform_1, window_bounds = array<i64: 1, 128>}, {pipeline_mode = #tpu.pipeline_mode<synchronous>, transform_indices = @transform_2, window_bounds = array<i64: 1, 128>}, {transform_indices = @transform_3, window_bounds = array<i64: 1, 16, 128>}, {transform_indices = @transform_4, window_bounds = array<i64: 1, 16, 128>}]} {
    %c0 = arith.constant 0 : index
    %c0_0 = arith.constant 0 : index
    %c0_1 = arith.constant 0 : index
    %0 = vector.load %arg1[%c0, %c0_0, %c0_1] : memref<1x16x128xf32, #tpu.memory_space<vmem>>, vector<1x16x128xf32>
    %1 = vector.shape_cast %0 : vector<1x16x128xf32> to vector<16x128xf32>
    %c0_2 = arith.constant 0 : index
    %c0_3 = arith.constant 0 : index
    %2 = vector.load %arg2[%c0_2, %c0_3] : memref<1x128xf32, #tpu.memory_space<vmem>>, vector<1x128xf32>
    %3 = vector.broadcast %2 : vector<1x128xf32> to vector<16x128xf32>
    %4 = arith.mulf %1, %3 : vector<16x128xf32>
    %c0_4 = arith.constant 0 : index
    %c0_5 = arith.constant 0 : index
    %5 = vector.load %arg3[%c0_4, %c0_5] : memref<1x128xf32, #tpu.memory_space<vmem>>, vector<1x128xf32>
    %6 = vector.broadcast %5 : vector<1x128xf32> to vector<16x128xf32>
    %7 = arith.addf %4, %6 : vector<16x128xf32>
    %c0_6 = arith.constant 0 : index
    %c0_7 = arith.constant 0 : index
    %c0_8 = arith.constant 0 : index
    %8 = vector.load %arg4[%c0_6, %c0_7, %c0_8] : memref<1x16x128xf32, #tpu.memory_space<vmem>>, vector<1x16x128xf32>
    %9 = vector.shape_cast %8 : vector<1x16x128xf32> to vector<16x128xf32>
    %10 = arith.addf %7, %9 : vector<16x128xf32>
    %cst = arith.constant 0.000000e+00 : f32
    %11 = vector.broadcast %cst : f32 to vector<16x128xf32>
    %12 = arith.maximumf %10, %11 : vector<16x128xf32>
    %c0_9 = arith.constant 0 : index
    %c0_10 = arith.constant 0 : index
    %c0_11 = arith.constant 0 : index
    %13 = vector.load %arg5[%c0_9, %c0_10, %c0_11] : memref<1x16x128xf32, #tpu.memory_space<vmem>>, vector<1x16x128xf32>
    %14 = vector.shape_cast %13 : vector<1x16x128xf32> to vector<16x128xf32>
    %15 = vector.shape_cast %12 : vector<16x128xf32> to vector<1x16x128xf32>
    tpu.vector_store %arg5[%c0_9, %c0_10, %c0_11], %15 {strides = array<i32>} : memref<1x16x128xf32, #tpu.memory_space<vmem>>, vector<1x16x128xf32>,
    return
  }
  func.func @transform_0(%arg0: i32) -> (i32, i32, i32) {
    %c0_i32 = arith.constant 0 : i32
    %c0_i32_0 = arith.constant 0 : i32
    %c0_i32_1 = arith.constant 0 : i32
    return %arg0, %c0_i32, %c0_i32_0 : i32, i32, i32
  }
  func.func @transform_1(%arg0: i32) -> (i32, i32) {
    %c0_i32 = arith.constant 0 : i32
    %c0_i32_0 = arith.constant 0 : i32
    %c0_i32_1 = arith.constant 0 : i32
    return %c0_i32, %c0_i32_0 : i32, i32
  }
  func.func @transform_2(%arg0: i32) -> (i32, i32) {
    %c0_i32 = arith.constant 0 : i32
    %c0_i32_0 = arith.constant 0 : i32
    %c0_i32_1 = arith.constant 0 : i32
    return %c0_i32, %c0_i32_0 : i32, i32
  }
  func.func @transform_3(%arg0: i32) -> (i32, i32, i32) {
    %c0_i32 = arith.constant 0 : i32
    %c0_i32_0 = arith.constant 0 : i32
    %c0_i32_1 = arith.constant 0 : i32
    return %arg0, %c0_i32, %c0_i32_0 : i32, i32, i32
  }
  func.func @transform_4(%arg0: i32) -> (i32, i32, i32) {
    %c0_i32 = arith.constant 0 : i32
    %c0_i32_0 = arith.constant 0 : i32
    %c0_i32_1 = arith.constant 0 : i32
    return %arg0, %c0_i32, %c0_i32_0 : i32, i32, i32
  }
}

</mosaic_0001>

<bundles_post_ra>
// kernel: residual_block.4
= control target key start
LH: loop header
LB: loop body
LE: loop exit
PB: predicated region body
PF: predicated region fallthrough
CT: control target
= control target key end

     0   :  { %s528_s12 = smov 0   ;;  %s715_s0 = inlined_call_operand.vmem [shape: f32[2,16,128], index: 0, kind: input, shape index: {}]   ;;  %s716_s1 = inlined_call_operand.vmem [shape: f32[3,128,128], index: 1, kind: input, shape index: {}]   ;;  %s717_s2 = inlined_call_operand.vmem [shape: f32[2,16,128], index: 2, kind: output, shape index: {0}]   ;;  %s718_s3 = inlined_call_operand.vmem [shape: f32[2,2,128], index: 3, kind: output, shape index: {1}]  }
   0x1 LB: > { %s427_s13 = sadd.s32 4294967295, %s506_s12   ;;  %p431_p0 = scmp.ge.s32.totalorder %s506_s12, 1  ;;  %s506_s12 = sphi %s528_s12, %s14_s12  }
   0x2   : > { %p140_p1 = scmp.lt.s32.totalorder %s506_s12, 3 }
   0x4   : > { %p141_p2 = pnand %p431_p0, %p140_p1 }
   0x5   : > { %p589_p3 = scmp.lt.s32.totalorder (!%p141_p2), %s427_s13, 1 }
   0x6   : > { %144 = sbr.rel (%p141_p2) target bundleno = 203 (0xcb), region = 28 }
   0xb   : > { %v470_v0 = vld [vmem:[%s716_s1 + $0x178] sm:$0xff]  ;;  %v469_v1 = vld [vmem:[%s716_s1 + $0x170] sm:$0xff]  ;;  %v468_v5 = vld [vmem:[%s716_s1 + $0x168] sm:$0xff]  ;;  %s721_s13 = smov (!%p589_p3, %s427_s13), 1  ;;  %vm193_vm0 = vcmask 1046528   ;;  %vm186_vm1 = vcmask 1040384  }
   0xc   : > { %v452_v2 = vld [vmem:[%s716_s1 + $0xf8] sm:$0xff]  ;;  %296 = vmatpush.msra.mxu2 %v470_v0  ;;  %v451_v4 = vld [vmem:[%s716_s1 + $0xf0] sm:$0xff]  ;;  %v450_v7 = vld [vmem:[%s716_s1 + $0xe8] sm:$0xff]  ;;  %s474_s23 = sshll.u32 %s721_s13, 4 }
   0xd   : > { %233 = vmatpush.msra.mxu0 %v452_v2  ;;  %v215_v3 = vld [vmem:[%s716_s1 + $0x78] sm:$0xff]  ;;  %476 = vmatpush.msra.mxu3 %v452_v2  ;;  %v214_v6 = vld [vmem:[%s716_s1 + $0x70] sm:$0xff]  ;;  %v213_v8 = vld [vmem:[%s716_s1 + $0x68] sm:$0xff]  ;;  %s172_s7 = scalar_lea.vmem %s715_s0, %s474_s23  ;;  %s177_s18 = scalar_lea.vmem %s717_s2, %s474_s23 }
   0xe   : > { %256 = vmatpush.msra.mxu1 %v215_v3  ;;  %297 = vmatpush.msra.mxu2 %v469_v1  ;;  %v467_v9 = vld [vmem:[%s716_s1 + $0x160] sm:$0xff]  ;;  %v466_v12 = vld [vmem:[%s716_s1 + $0x158] sm:$0xff]  ;;  %v465_v15 = vld [vmem:[%s716_s1 + $0x150] sm:$0xff]  ;;  %s436_s23 = sshll.u32 %s721_s13, 1 }
   0xf   : > { %234 = vmatpush.msra.mxu0 %v451_v4  ;;  %477 = vmatpush.msra.mxu3 %v451_v4  ;;  %v449_v10 = vld [vmem:[%s716_s1 + $0xe0] sm:$0xff]  ;;  %v448_v13 = vld [vmem:[%s716_s1 + $0xd8] sm:$0xff]  ;;  %v447_v16 = vld [vmem:[%s716_s1 + $0xd0] sm:$0xff]  ;;  %s181_s21 = scalar_lea.vmem %s718_s3, %s436_s23 }
  0x10   : > { %257 = vmatpush.msra.mxu1 %v214_v6  ;;  %298 = vmatpush.msra.mxu2 %v468_v5  ;;  %v212_v11 = vld [vmem:[%s716_s1 + $0x60] sm:$0xff]  ;;  %v211_v14 = vld [vmem:[%s716_s1 + $0x58] sm:$0xff]  ;;  %v210_v17 = vld [vmem:[%s716_s1 + $0x50] sm:$0xff] }
  0x11   : > { %235 = vmatpush.msra.mxu0 %v450_v7  ;;  %478 = vmatpush.msra.mxu3 %v450_v7  ;;  %v464_v18 = vld [vmem:[%s716_s1 + $0x148] sm:$0xff]  ;;  %v463_v21 = vld [vmem:[%s716_s1 + $0x140] sm:$0xff]  ;;  %v462_v24 = vld [vmem:[%s716_s1 + $0x138] sm:$0xff] }
  0x12   : > { %258 = vmatpush.msra.mxu1 %v213_v8  ;;  %299 = vmatpush.msra.mxu2 %v467_v9  ;;  %v446_v19 = vld [vmem:[%s716_s1 + $0xc8] sm:$0xff]  ;;  %v445_v22 = vld [vmem:[%s716_s1 + $0xc0] sm:$0xff]  ;;  %v444_v25 = vld [vmem:[%s716_s1 + $0xb8] sm:$0xff] }
  0x13   : > { %236 = vmatpush.msra.mxu0 %v449_v10  ;;  %479 = vmatpush.msra.mxu3 %v449_v10  ;;  %v209_v20 = vld [vmem:[%s716_s1 + $0x48] sm:$0xff]  ;;  %v208_v23 = vld [vmem:[%s716_s1 + $0x40] sm:$0xff]  ;;  %v207_v26 = vld [vmem:[%s716_s1 + $0x38] sm:$0xff] }
  0x14   : > { %259 = vmatpush.msra.mxu1 %v212_v11  ;;  %300 = vmatpush.msra.mxu2 %v466_v12  ;;  %v461_v27 = vld [vmem:[%s716_s1 + $0x130] sm:$0xff]  ;;  %v460_v30 = vld [vmem:[%s716_s1 + $0x128] sm:$0xff]  ;;  %v459_v33 = vld [vmem:[%s716_s1 + $0x120] sm:$0xff] }
  0x15   : > { %237 = vmatpush.msra.mxu0 %v448_v13  ;;  %480 = vmatpush.msra.mxu3 %v448_v13  ;;  %v443_v28 = vld [vmem:[%s716_s1 + $0xb0] sm:$0xff]  ;;  %v442_v31 = vld [vmem:[%s716_s1 + $0xa8] sm:$0xff]  ;;  %v441_v34 = vld [vmem:[%s716_s1 + $0xa0] sm:$0xff] }
  0x16   : > { %260 = vmatpush.msra.mxu1 %v211_v14  ;;  %301 = vmatpush.msra.mxu2 %v465_v15  ;;  %v206_v29 = vld [vmem:[%s716_s1 + $0x30] sm:$0xff]  ;;  %v205_v32 = vld [vmem:[%s716_s1 + $0x28] sm:$0xff]  ;;  %v458_v35 = vld [vmem:[%s716_s1 + $0x118] sm:$0xff] }
  0x17   : > { %238 = vmatpush.msra.mxu0 %v447_v16  ;;  %481 = vmatpush.msra.mxu3 %v447_v16  ;;  %v204_v36 = vld [vmem:[%s716_s1 + $0x20] sm:$0xff]  ;;  %v440_v37 = vld [vmem:[%s716_s1 + $0x98] sm:$0xff]  ;;  %v183_v39 = vld [vmem:[%s172_s7 + $0x8] sm:$0xff] }
  0x18   : > { %261 = vmatpush.msra.mxu1 %v210_v17  ;;  %302 = vmatpush.msra.mxu2 %v464_v18  ;;  %v182_v38 = vld [vmem:[%s172_s7] sm:$0xff]  ;;  %v203_v40 = vld [vmem:[%s716_s1 + $0x18] sm:$0xff]  ;;  %v457_v41 = vld [vmem:[%s716_s1 + $0x110] sm:$0xff]  ;;  %v195_v45 = vrot.slane %v183_v39, 1  ;;  %v188_v54 = vrot.slane %v183_v39, 7 }
  0x19   : > { %239 = vmatpush.msra.mxu0 %v446_v19  ;;  %482 = vmatpush.msra.mxu3 %v446_v19  ;;  %v439_v42 = vld [vmem:[%s716_s1 + $0x90] sm:$0xff]  ;;  %v194_v44 = vrot.slane %v182_v38, 1  ;;  %v456_v46 = vld [vmem:[%s716_s1 + $0x108] sm:$0xff]  ;;  %v455_v49 = vld [vmem:[%s716_s1 + $0x100] sm:$0xff]  ;;  %v187_v53 = vrot.slane %v182_v38, 7 }
  0x1a   : > { %262 = vmatpush.msra.mxu1 %v209_v20  ;;  %303 = vmatpush.msra.mxu2 %v463_v21  ;;  %v202_v43 = vld [vmem:[%s716_s1 + $0x10] sm:$0xff]  ;;  %v438_v47 = vld [vmem:[%s716_s1 + $0x88] sm:$0xff]  ;;  %v437_v50 = vld [vmem:[%s716_s1 + $0x80] sm:$0xff] }
  0x1b   : > { %240 = vmatpush.msra.mxu0 %v445_v22  ;;  %483 = vmatpush.msra.mxu3 %v445_v22  ;;  %v201_v48 = vld [vmem:[%s716_s1 + $0x8] sm:$0xff]  ;;  %v196_v51 = vsel %vm193_vm0, %v194_v44, %v195_v45  ;;  %v200_v52 = vld [vmem:[%s716_s1] sm:$0xff]  ;;  %vm453_vm2 = vmneg %vm186_vm1  ;;  %v189_v55 = vsel %vm186_vm1, %v187_v53, %v188_v54 }
  0x1c   : > { %263 = vmatpush.msra.mxu1 %v208_v23  ;;  %304 = vmatpush.msra.mxu2 %v462_v24 }
  0x1d   : > { %241 = vmatpush.msra.mxu0 %v444_v25  ;;  %484 = vmatpush.msra.mxu3 %v444_v25 }
  0x1e   : > { %264 = vmatpush.msra.mxu1 %v207_v26  ;;  %305 = vmatpush.msra.mxu2 %v461_v27 }
  0x1f   : > { %242 = vmatpush.msra.mxu0 %v443_v28  ;;  %485 = vmatpush.msra.mxu3 %v443_v28 }
  0x20   : > { %265 = vmatpush.msra.mxu1 %v206_v29  ;;  %306 = vmatpush.msra.mxu2 %v460_v30 }
  0x21   : > { %243 = vmatpush.msra.mxu0 %v442_v31  ;;  %486 = vmatpush.msra.mxu3 %v442_v31 }
  0x22   : > { %266 = vmatpush.msra.mxu1 %v205_v32  ;;  %307 = vmatpush.msra.mxu2 %v459_v33 }
  0x23   : > { %244 = vmatpush.msra.mxu0 %v441_v34  ;;  %487 = vmatpush.msra.mxu3 %v441_v34 }
  0x24   : > { %267 = vmatpush.msra.mxu1 %v204_v36  ;;  %308 = vmatpush.msra.mxu2 %v458_v35 }
  0x25   : > { %245 = vmatpush.msra.mxu0 %v440_v37  ;;  %488 = vmatpush.msra.mxu3 %v440_v37 }
  0x26   : > { %268 = vmatpush.msra.mxu1 %v203_v40  ;;  %309 = vmatpush.msra.mxu2 %v457_v41 }
  0x27   : > { %246 = vmatpush.msra.mxu0 %v439_v42  ;;  %489 = vmatpush.msra.mxu3 %v439_v42 }
  0x28   : > { %269 = vmatpush.msra.mxu1 %v202_v43  ;;  %310 = vmatpush.msra.mxu2 %v456_v46 }
  0x29   : > { %247 = vmatpush.msra.mxu0 %v438_v47  ;;  %490 = vmatpush.msra.mxu3 %v438_v47 }
  0x2a   : > { %270 = vmatpush.msra.mxu1 %v201_v48  ;;  %311 = vmatpush.msra.mxu2 %v455_v49 }
  0x2b   : > { %248 = vmatpush.msra.mxu0 %v437_v50  ;;  %312 = vmatmul.f32.vlgmr.msra.gmra.mxu2 %v196_v51 }
  0x2c   : > { %271 = vmatpush.msra.mxu1 %v200_v52  ;;  %249 = vmatmul.f32.vlgmr.msra.gmra.mxu0 %v182_v38 }
  0x2d   : > { %454 = vmatmul.msk.f32.vlgmr.msra.gmra.mxu1 %vm453_vm2, %v187_v53  ;;  %491 = vmatpush.msra.mxu3 %v437_v50 }
  0x2e   : > { %252 = vmatmul.f32.vlgmr.msra.gmra.mxu3 %v183_v39 }
  0x33   : > { %471 = vmatmul.msk.f32.gmra.mxu2 %vm193_vm0, %v195_v45 }
  0x35   : > { %275 = vmatmul.f32.gmra.mxu1 %v189_v55 }
  0xa9   : > { %v250_v56 = vpop.f32.mrf.mxu0 }
  0xaa   : > { %v273_v57 = vpop.f32.mrf.mxu1 }
  0xab   : > { %v274_v58 = vadd.f32 %v273_v57, %v250_v56 }
  0xae   : > { %v313_v59 = vpop.f32.mrf.mxu2 }
  0xaf   : > { %v319_v60 = vadd.f32 %v313_v59, %v274_v58 }
  0xb1   : > { %321 = vst [vmem:[%s177_s18] sm:$0xff] %v319_v60  ;;  %v253_v61 = vpop.f32.mrf.mxu3  ;;  %v330_v2 = vmul.f32 %v319_v60, %v319_v60 }
  0xb2   : > { %v276_v62 = vpop.f32.mrf.mxu1 }
  0xb3   : > { %v277_v63 = vadd.f32 %v276_v62, %v253_v61 }
  0xb6   : > { %v316_v0 = vpop.f32.mrf.mxu2 }
  0xb7   : > { %v320_v1 = vadd.f32 %v316_v0, %v277_v63 }
  0xb9   : > { %322 = vst [vmem:[%s177_s18 + $0x8] sm:$0xff] %v320_v1  ;;  %v323_v3 = vadd.f32 %v320_v1, %v319_v60  ;;  %v331_v4 = vmul.f32 %v320_v1, %v320_v1 }
  0xbb   : > { %v324_v5 = vrot.slane %v323_v3, 4  ;;  %v332_v6 = vadd.f32 %v331_v4, %v330_v2 }
  0xbd   : > { %v325_v7 = vadd.f32 %v324_v5, %v323_v3  ;;  %v333_v8 = vrot.slane %v332_v6, 4 }
  0xbf   : > { %v326_v9 = vrot.slane %v325_v7, 2  ;;  %v334_v10 = vadd.f32 %v333_v8, %v332_v6 }
  0xc1   : > { %v327_v11 = vadd.f32 %v326_v9, %v325_v7  ;;  %v335_v12 = vrot.slane %v334_v10, 2 }
  0xc3   : > { %v328_v13 = vrot.slane %v327_v11, 1  ;;  %v336_v14 = vadd.f32 %v335_v12, %v334_v10 }
  0xc5   : > { %v337_v15 = vrot.slane %v336_v14, 1  ;;  %v329_v16 = vadd.f32 %v328_v13, %v327_v11 }
  0xc7   : > { %v338_v17 = vadd.f32 %v337_v15, %v336_v14 }
  0xc9   : > { %v339_v18 = vsel %vm186_vm1, %v329_v16, %v338_v17 }
  0xca   : > { %340 = vst [vmem:[%s181_s21] sm:$0x3] %v339_v18 }
  0xcb PF: > { %s14_s12 = sadd.s32 1, %s506_s12  }
  0xcc   : > { %p11_p4 = scmp.ge.s32.totalorder %s14_s12, 4  }
  0xce   :  { %13 = sbr.rel (!%p11_p4) target bundleno = 1 (0x1), region = 72 }

// kernel: tile.23
= control target key start
LH: loop header
LB: loop body
LE: loop exit
PB: predicated region body
PF: predicated region fallthrough
CT: control target
= control target key end

     0   :  { %s28_s0 = inlined_call_operand.vmem [shape: f32[8], index: 0, kind: input, shape index: {}]   ;;  %s29_s1 = inlined_call_operand.vmem [shape: f32[16,8], index: 1, kind: output, shape index: {}]  }
   0x1   :  { %v4_v0 = vld [vmem:[%s28_s0] ss:$0 sm:$0xff] }
   0x2   :  { %5 = vst [vmem:[%s29_s1] sm:$0xff] %v4_v0 }
   0x3   :  { %8 = vst [vmem:[%s29_s1 + $0x8] sm:$0xff] %v4_v0 }

// kernel: tile.24
= control target key start
LH: loop header
LB: loop body
LE: loop exit
PB: predicated region body
PF: predicated region fallthrough
CT: control target
= control target key end

     0   :  { %s131_s10 = smov 120   ;;  %s132_s11 = smov 104   ;;  %vm3_vm0 = vcmask 64512   ;;  %vm9_vm1 = vcmask 1048512   ;;  %vm15_vm2 = vcmask 982912   ;;  %vm21_vm3 = vcmask 917312   ;;  %s207_s0 = inlined_call_operand.vmem [shape: f32[16,8], index: 0, kind: input, shape index: {}]   ;;  %s208_s1 = inlined_call_operand.vmem [shape: f32[1,128], index: 1, kind: output, shape index: {}]  }
   0x1   :  { %v101_v0 = vld [vmem:[%s207_s0 + $0xf] sm:$0x1]   ;;  %v103_v1 = vld [vmem:[%s207_s0 + $0xd] sm:$0x1]   ;;  %v105_v2 = vld [vmem:[%s207_s0 + $0xb] sm:$0x1]  }
   0x2   :  { %7 = vrot.lane.b32.xlu0 %v101_v0, %s131_s10  ;;  %19 = vrot.lane.b32.xlu1 %v103_v1, %s132_s11  ;;  %s133_s14 = smov 88   ;;  %v102_v3 = vld [vmem:[%s207_s0 + $0xe] sm:$0x1]   ;;  %v104_v4 = vld [vmem:[%s207_s0 + $0xc] sm:$0x1]   ;;  %s134_s19 = smov 112  }
   0x3   :  { %31 = vrot.lane.b32.xlu2 %v105_v2, %s133_s14  ;;  %s135_s20 = smov 96   ;;  %v106_v5 = vld [vmem:[%s207_s0 + $0xa] sm:$0x1]   ;;  %s136_s23 = smov 80   ;;  %v107_v6 = vld [vmem:[%s207_s0 + $0x9] sm:$0x1]  }
   0x4   :  { %v108_v7 = vld [vmem:[%s207_s0 + $0x8] sm:$0x1]   ;;  %s137_s28 = smov 72   ;;  %s138_s29 = smov 64   ;;  %v109_v8 = vld [vmem:[%s207_s0 + $0x7] sm:$0x1]  }
   0x5   :  { %s139_s3 = smov 56   ;;  %v110_v9 = vld [vmem:[%s207_s0 + $0x6] sm:$0x1]   ;;  %v111_v10 = vld [vmem:[%s207_s0 + $0x5] sm:$0x1]   ;;  %s140_s8 = smov 48  }
   0x6   :  { %s141_s9 = smov 40   ;;  %v112_v11 = vld [vmem:[%s207_s0 + $0x4] sm:$0x1]   ;;  %s142_s12 = smov 32   ;;  %v113_v12 = vld [vmem:[%s207_s0 + $0x3] sm:$0x1]  }
   0x7   :  { %v114_v13 = vld [vmem:[%s207_s0 + $0x2] sm:$0x1]   ;;  %s143_s17 = smov 24   ;;  %s144_s18 = smov 16   ;;  %v115_v14 = vld [vmem:[%s207_s0 + $0x1] sm:$0x1]  }
   0x8   :  { %s145_s21 = smov 8   ;;  %v2_v15 = vld [vmem:[%s207_s0] sm:$0x1]   ;;  %vm27_vm4 = vcmask 851712   ;;  %vm33_vm5 = vcmask 786112   ;;  %vm39_vm6 = vcmask 720512  }
   0x9   :  { %4 = vst.msk [vmem:[#allocation0] sm:$0x1] %vm3_vm0, %v2_v15   ;;  %vm45_vm7 = vcmask 654912   ;;  %vm51_vm8 = vcmask 589312   ;;  %vm57_vm9 = vcmask 523712   ;;  %vm63_vm10 = vcmask 458112  }
   0xa   :  { %13 = vrot.lane.b32.xlu0 %v102_v3, %s134_s19  ;;  %25 = vrot.lane.b32.xlu1 %v104_v4, %s135_s20  ;;  %vm69_vm11 = vcmask 392512   ;;  %vm75_vm12 = vcmask 326912   ;;  %vm81_vm13 = vcmask 261312   ;;  %vm87_vm14 = vcmask 195712  }
   0xb   :  { %37 = vrot.lane.b32.xlu2 %v106_v5, %s136_s23  ;;  %vm93_vm15 = vcmask 130112  }
  0x12   :  { %43 = vrot.lane.b32.xlu0 %v107_v6, %s137_s28  ;;  %49 = vrot.lane.b32.xlu1 %v108_v7, %s138_s29 }
  0x13   :  { %55 = vrot.lane.b32.xlu2 %v109_v8, %s139_s3 }
  0x1a   :  { %61 = vrot.lane.b32.xlu0 %v110_v9, %s140_s8  ;;  %67 = vrot.lane.b32.xlu1 %v111_v10, %s141_s9 }
  0x1b   :  { %73 = vrot.lane.b32.xlu2 %v112_v11, %s142_s12 }
  0x22   :  { %79 = vrot.lane.b32.xlu0 %v113_v12, %s143_s17  ;;  %85 = vrot.lane.b32.xlu1 %v114_v13, %s144_s18 }
  0x23   :  { %91 = vrot.lane.b32.xlu2 %v115_v14, %s145_s21 }
  0x5d   :  { %v32_v16 = vpop.permute.xlu2 %31  }
  0x65   :  { %v38_v17 = vpop.permute.xlu2 %37  }
  0x6d   :  { %v56_v18 = vpop.permute.xlu2 %55  }
  0x74   :  { %v8_v19 = vpop.permute.xlu0 %7   ;;  %v20_v20 = vpop.permute.xlu1 %19  }
  0x75   :  { %10 = vst.msk [vmem:[#allocation0] sm:$0x1] %vm9_vm1, %v8_v19   ;;  %v74_v21 = vpop.permute.xlu2 %73  }
  0x7c   :  { %v14_v22 = vpop.permute.xlu0 %13   ;;  %v26_v23 = vpop.permute.xlu1 %25  }
  0x7d   :  { %16 = vst.msk [vmem:[#allocation0] sm:$0x1] %vm15_vm2, %v14_v22   ;;  %v92_v24 = vpop.permute.xlu2 %91  }
  0x7e   :  { %22 = vst.msk [vmem:[#allocation0] sm:$0x1] %vm21_vm3, %v20_v20  }
  0x7f   :  { %28 = vst.msk [vmem:[#allocation0] sm:$0x1] %vm27_vm4, %v26_v23  }
  0x80   :  { %34 = vst.msk [vmem:[#allocation0] sm:$0x1] %vm33_vm5, %v32_v16  }
  0x81   :  { %40 = vst.msk [vmem:[#allocation0] sm:$0x1] %vm39_vm6, %v38_v17  }
  0x84   :  { %v44_v25 = vpop.permute.xlu0 %43   ;;  %v50_v26 = vpop.permute.xlu1 %49  }
  0x85   :  { %46 = vst.msk [vmem:[#allocation0] sm:$0x1] %vm45_vm7, %v44_v25  }
  0x86   :  { %52 = vst.msk [vmem:[#allocation0] sm:$0x1] %vm51_vm8, %v50_v26  }
  0x87   :  { %58 = vst.msk [vmem:[#allocation0] sm:$0x1] %vm57_vm9, %v56_v18  }
  0x8c   :  { %v62_v27 = vpop.permute.xlu0 %61   ;;  %v68_v28 = vpop.permute.xlu1 %67  }
  0x8d   :  { %64 = vst.msk [vmem:[#allocation0] sm:$0x1] %vm63_vm10, %v62_v27  }
  0x8e   :  { %70 = vst.msk [vmem:[#allocation0] sm:$0x1] %vm69_vm11, %v68_v28  }
  0x8f   :  { %76 = vst.msk [vmem:[#allocation0] sm:$0x1] %vm75_vm12, %v74_v21  }
  0x94   :  { %v80_v29 = vpop.permute.xlu0 %79   ;;  %v86_v30 = vpop.permute.xlu1 %85  }
  0x95   :  { %82 = vst.msk [vmem:[#allocation0] sm:$0x1] %vm81_vm13, %v80_v29  }
  0x96   :  { %88 = vst.msk [vmem:[#allocation0] sm:$0x1] %vm87_vm14, %v86_v30  }
  0x97   :  { %94 = vst.msk [vmem:[#allocation0] sm:$0x1] %vm93_vm15, %v92_v24  }
  0x9e   :  { %v97_v31 = vld [vmem:[#allocation0] sm:$0x1] }
  0x9f   :  { %100 = vst [vmem:[%s208_s1] sm:$0x1] %v97_v31 }

// kernel: residual_block.5
= control target key start
LH: loop header
LB: loop body
LE: loop exit
PB: predicated region body
PF: predicated region fallthrough
CT: control target
= control target key end

     0   :  { %s295_s12 = smov 0   ;;  %s312_s0 = inlined_call_operand.vmem [shape: f32[2,16,128], index: 0, kind: input, shape index: {}]   ;;  %s313_s1 = inlined_call_operand.vmem [shape: f32[1,128], index: 1, kind: input, shape index: {}]   ;;  %s314_s2 = inlined_call_operand.vmem [shape: f32[1,128], index: 2, kind: input, shape index: {}]   ;;  %s315_s3 = inlined_call_operand.vmem [shape: f32[2,16,128], index: 3, kind: output, shape index: {}]  }
   0x1 LB: > { %s244_s13 = sadd.s32 4294967295, %s273_s12   ;;  %p248_p0 = scmp.ge.s32.totalorder %s273_s12, 1  ;;  %s273_s12 = sphi %s295_s12, %s13_s12  }
   0x2   : > { %p137_p1 = scmp.lt.s32.totalorder %s273_s12, 3 }
   0x4   : > { %p138_p2 = pnand %p248_p0, %p137_p1 }
   0x5   : > { %p161_p3 = scmp.lt.s32.totalorder (!%p138_p2), %s244_s13, 1 }
   0x6   : > { %141 = sbr.rel (%p138_p2) target bundleno = 23 (0x17), region = 32 }
   0xb   : > { %s317_s13 = smov (!%p161_p3, %s244_s13), 1  ;;  %v265_v0 = vld [vmem:[%s313_s1] ss:$0 sm:$0xff] }
   0xc   : > { %s255_s16 = sshll.u32 %s317_s13, 4  ;;  %v266_v1 = vld [vmem:[%s314_s2] ss:$0 sm:$0xff] }
   0xd   : > { %s165_s19 = scalar_lea.vmem %s312_s0, %s255_s16  ;;  %s170_s24 = scalar_lea.vmem %s315_s3, %s255_s16 }
   0xe   : > { %v171_v2 = vld [vmem:[%s165_s19] sm:$0xff]  ;;  %v172_v3 = vld [vmem:[%s165_s19 + $0x8] sm:$0xff] }
   0xf   : > { %v177_v4 = vmul.f32 %v265_v0, %v171_v2  ;;  %v178_v5 = vmul.f32 %v265_v0, %v172_v3 }
  0x11   : > { %v183_v6 = vadd.f32 %v266_v1, %v177_v4  ;;  %v184_v7 = vadd.f32 %v266_v1, %v178_v5 }
  0x13   : > { %v185_v8 = vmax.f32 %v183_v6, 0.0  ;;  %v186_v9 = vmax.f32 %v184_v7, 0.0 }
  0x15   : > { %187 = vst [vmem:[%s170_s24] sm:$0xff] %v185_v8 }
  0x16   : > { %188 = vst [vmem:[%s170_s24 + $0x8] sm:$0xff] %v186_v9 }
  0x17 PF: > { %s13_s12 = sadd.s32 1, %s273_s12  }
  0x18   : > { %p10_p4 = scmp.ge.s32.totalorder %s13_s12, 4  }
  0x1a   :  { %12 = sbr.rel (!%p10_p4) target bundleno = 1 (0x1), region = 62 }

// kernel: residual_block.7
= control target key start
LH: loop header
LB: loop body
LE: loop exit
PB: predicated region body
PF: predicated region fallthrough
CT: control target
= control target key end

     0   :  { %s366_s15 = smov 0   ;;  %s392_s0 = inlined_call_operand.vmem [shape: f32[2,16,128], index: 0, kind: input, shape index: {}]   ;;  %s393_s1 = inlined_call_operand.vmem [shape: f32[1,128], index: 1, kind: input, shape index: {}]   ;;  %s394_s2 = inlined_call_operand.vmem [shape: f32[1,128], index: 2, kind: input, shape index: {}]   ;;  %s395_s3 = inlined_call_operand.vmem [shape: f32[2,16,128], index: 3, kind: input, shape index: {}]   ;;  %s396_s4 = inlined_call_operand.vmem [shape: f32[2,16,128], index: 4, kind: output, shape index: {}]  }
   0x1 LB: > { %s307_s16 = sadd.s32 4294967295, %s339_s15   ;;  %p311_p0 = scmp.ge.s32.totalorder %s339_s15, 1  ;;  %s339_s15 = sphi %s366_s15, %s14_s15  }
   0x2   : > { %p172_p1 = scmp.lt.s32.totalorder %s339_s15, 3 }
   0x4   : > { %p173_p2 = pnand %p311_p0, %p172_p1 }
   0x5   : > { %p203_p3 = scmp.lt.s32.totalorder (!%p173_p2), %s307_s16, 1 }
   0x6   : > { %176 = sbr.rel (%p173_p2) target bundleno = 25 (0x19), region = 36 }
   0xb   : > { %s398_s16 = smov (!%p203_p3, %s307_s16), 1  ;;  %v331_v0 = vld [vmem:[%s393_s1] ss:$0 sm:$0xff] }
   0xc   : > { %s320_s19 = sshll.u32 %s398_s16, 4  ;;  %v332_v1 = vld [vmem:[%s394_s2] ss:$0 sm:$0xff] }
   0xd   : > { %s207_s22 = scalar_lea.vmem %s392_s0, %s320_s19  ;;  %s212_s25 = scalar_lea.vmem %s395_s3, %s320_s19 }
   0xe   : > { %v218_v2 = vld [vmem:[%s207_s22] sm:$0xff]  ;;  %v219_v3 = vld [vmem:[%s207_s22 + $0x8] sm:$0xff]  ;;  %s217_s30 = scalar_lea.vmem %s396_s4, %s320_s19 }
   0xf   : > { %v224_v4 = vmul.f32 %v331_v0, %v218_v2  ;;  %v225_v5 = vmul.f32 %v331_v0, %v219_v3  ;;  %v232_v6 = vld [vmem:[%s212_s25] sm:$0xff]  ;;  %v233_v7 = vld [vmem:[%s212_s25 + $0x8] sm:$0xff] }
  0x11   : > { %v230_v8 = vadd.f32 %v332_v1, %v224_v4  ;;  %v231_v9 = vadd.f32 %v332_v1, %v225_v5 }
  0x13   : > { %v234_v10 = vadd.f32 %v232_v6, %v230_v8  ;;  %v235_v11 = vadd.f32 %v233_v7, %v231_v9 }
  0x15   : > { %v236_v12 = vmax.f32 %v234_v10, 0.0  ;;  %v237_v13 = vmax.f32 %v235_v11, 0.0 }
  0x17   : > { %238 = vst [vmem:[%s217_s30] sm:$0xff] %v236_v12 }
  0x18   : > { %239 = vst [vmem:[%s217_s30 + $0x8] sm:$0xff] %v237_v13 }
  0x19 PF: > { %s14_s15 = sadd.s32 1, %s339_s15  }
  0x1a   : > { %p11_p4 = scmp.ge.s32.totalorder %s14_s15, 4  }
  0x1c   :  { %13 = sbr.rel (!%p11_p4) target bundleno = 1 (0x1), region = 69 }

</bundles_post_ra>
